<compile_context>
chip_gen: v7x
topology: tpu7x:2x2x1
jax: 0.10.0
libtpu: 0.0.40
codegen_flags: <defaults>
</compile_context>

<pallas_src>
import functools

import jax
import jax.numpy as jnp
from jax import lax
from jax.experimental import pallas as pl
from jax.experimental.pallas import tpu as pltpu


def _round_up(x, m):
    return (x + m - 1) // m * m


def _patch_embed_kernel(x_ref, w_ref, b_ref, o_ref):
    # x_ref: (TM, K_pad), w_ref: (K_pad, E_pad), b_ref: (1, E_pad) f32,
    # o_ref: (TM, E_pad).  MXU matmul with f32 accumulation, bias add on VPU.
    acc = jnp.dot(x_ref[...], w_ref[...], preferred_element_type=jnp.float32)
    o_ref[...] = (acc + b_ref[...]).astype(o_ref.dtype)


def _working_set_bytes(tm, k_pad, e_pad, in_itemsize, out_itemsize):
    return (
        2 * tm * k_pad * in_itemsize      # activation tile, double-buffered
        + 2 * tm * e_pad * out_itemsize   # output tile, double-buffered
        + tm * e_pad * 4                  # f32 accumulator live in the body
        + 2 * k_pad * e_pad * in_itemsize # resident weight (2 bufs allocated)
        + 2 * e_pad * 4                   # bias
    )


@functools.partial(
    jax.jit, static_argnames=("patch_size", "out_dtype", "compute_dtype")
)
def patch_embed(x_nchw, weight, bias, *, patch_size, out_dtype=None,
                compute_dtype=jnp.bfloat16):
    """x_nchw: (B, C, H, W); weight: (E, C, p, p); bias: (E,).

    compute_dtype: MXU operand dtype (default bf16; accumulation is always f32).
      This is an intentional precision policy — pass compute_dtype=None to keep
      the input dtype (exact PyTorch f32 Conv2d semantics, slower on the MXU).
    out_dtype: output dtype (default: same as x_nchw; pass jnp.bfloat16 to
      halve the output HBM stream for bf16 downstream blocks).
    """
    B, C, H, W = x_nchw.shape
    E = weight.shape[0]
    p = patch_size
    assert H % p == 0 and W % p == 0, "img_size must be divisible by patch_size"
    hp, wp = H // p, W // p
    n_patches = hp * wp

    cdt = jnp.dtype(compute_dtype) if compute_dtype is not None else jnp.dtype(x_nchw.dtype)
    out_dt = jnp.dtype(out_dtype) if out_dtype is not None else jnp.dtype(x_nchw.dtype)

    # --- im2col glue (pure JAX; cast first so the transpose moves bf16 bytes,
    # and allow_input_fusion lets XLA fold cast/pad into the input DMA) -------
    xc = x_nchw.astype(cdt)
    x_patches = xc.reshape(B, C, hp, p, wp, p)
    x_patches = jnp.transpose(x_patches, (0, 2, 4, 1, 3, 5))   # (B, hp, wp, C, p, p)
    x2d = x_patches.reshape(B * n_patches, C * p * p)

    w2d = weight.reshape(E, C * p * p).T.astype(cdt)           # (K, E)
    b2d = bias.astype(jnp.float32).reshape(1, E)

    M, K = x2d.shape

    # --- Tile / pad selection -------------------------------------------------
    K_pad = _round_up(K, 128)        # lane-dense contraction dim
    E_pad = _round_up(E, 128)        # lane-dense output dim (unmasked vst)

    # TM: big (amortizes ~0.35us/step grid overhead), multiple of 16 (bf16
    # sublane packing), balanced across tiles (no round_up(M, TM) blow-up),
    # shrunk until the double-buffered working set fits a 24 MiB budget that is
    # safe on v5e/v6e/v7x once vmem_limit_bytes is raised explicitly.
    VMEM_BUDGET = 24 * 1024 * 1024
    M16 = _round_up(M, 16)
    TM = min(1024, M16)
    n_tiles = pl.cdiv(M16, TM)
    TM = _round_up(pl.cdiv(M16, n_tiles), 16)                  # balance tiles
    while TM > 16 and _working_set_bytes(TM, K_pad, E_pad,
                                         cdt.itemsize, out_dt.itemsize) > VMEM_BUDGET:
        TM = _round_up(TM // 2, 16)
    n_tiles = pl.cdiv(M16, TM)
    M_pad = n_tiles * TM

    # Zero-pad so every tile is lane-dense and 128/16-aligned (zeros in the
    # padded K region of both operands keep the matmul exact).
    if (M_pad, K_pad) != (M, K):
        x2d = jnp.pad(x2d, ((0, M_pad - M), (0, K_pad - K)))
    if (K_pad, E_pad) != (K, E):
        w2d = jnp.pad(w2d, ((0, K_pad - K), (0, E_pad - E)))
    if E_pad != E:
        b2d = jnp.pad(b2d, ((0, 0), (0, E_pad - E)))

    vmem_limit = int(min(
        max(_working_set_bytes(TM, K_pad, E_pad, cdt.itemsize, out_dt.itemsize)
            + (8 << 20), 32 << 20),
        48 << 20))                     # stays under v7x's 64 MiB physical VMEM

    grid = (n_tiles,)

    out2d = pl.pallas_call(
        _patch_embed_kernel,
        out_shape=jax.ShapeDtypeStruct((M_pad, E_pad), out_dt),
        grid=grid,
        in_specs=[
            pl.BlockSpec((TM, K_pad), lambda i: (i, 0)),
            pl.BlockSpec((K_pad, E_pad), lambda i: (0, 0)),   # VMEM-resident
            pl.BlockSpec((1, E_pad), lambda i: (0, 0)),       # VMEM-resident
        ],
        out_specs=pl.BlockSpec((TM, E_pad), lambda i: (i, 0)),
        compiler_params=pltpu.CompilerParams(
            dimension_semantics=("parallel",),   # v7x megacore splits M tiles
            vmem_limit_bytes=vmem_limit,
            allow_input_fusion=[True, True, True],
        ),
        cost_estimate=pl.CostEstimate(
            flops=2 * M_pad * K_pad * E_pad,
            transcendentals=0,
            bytes_accessed=(M_pad * K_pad * cdt.itemsize        # activation once
                            + K_pad * E_pad * cdt.itemsize      # weight once
                            + E_pad * 4                         # bias once
                            + M_pad * E_pad * out_dt.itemsize), # output once
        ),
    )(x2d, w2d, b2d)

    return out2d[:M, :E].reshape(B, n_patches, E)


if __name__ == "__main__":
    # Small shapes consistent with the module: img=16, patch=4, in_ch=4, embed=32
    img_size, patch_size, in_ch, embed_dim = 16, 4, 4, 32
    B = 2

    key = jax.random.PRNGKey(0)
    kx, kw, kb = jax.random.split(key, 3)
    x = jax.random.normal(kx, (B, in_ch, img_size, img_size), dtype=jnp.float32)
    weight = jax.random.normal(
        kw, (embed_dim, in_ch, patch_size, patch_size), dtype=jnp.float32
    ) * 0.02
    bias = jax.random.normal(kb, (embed_dim,), dtype=jnp.float32) * 0.02

    out = patch_embed(x, weight, bias, patch_size=patch_size)
    out = jax.block_until_ready(out)

    # Reference with matched precision semantics (bf16 operands, f32 accumulate)
    # via XLA's conv, same layout transform as the PyTorch module.
    x_bf = x.astype(jnp.bfloat16).astype(jnp.float32)
    w_bf = weight.astype(jnp.bfloat16).astype(jnp.float32)
    ref = lax.conv_general_dilated(
        x_bf, w_bf,
        window_strides=(patch_size, patch_size),
        padding="VALID",
        dimension_numbers=("NCHW", "OIHW", "NCHW"),
    ) + bias.reshape(1, embed_dim, 1, 1)
    ref = ref.reshape(B, embed_dim, -1).transpose(0, 2, 1)

    n_patches = (img_size // patch_size) ** 2
    assert out.shape == (B, n_patches, embed_dim)
    assert out.dtype == x.dtype
    assert jnp.allclose(out, ref, atol=1e-3, rtol=1e-3), float(
        jnp.max(jnp.abs(out - ref))
    )

    # bf16-output knob (halves the largest HBM stream on v6e).
    out_bf16 = patch_embed(x, weight, bias, patch_size=patch_size,
                           out_dtype=jnp.bfloat16)
    out_bf16 = jax.block_until_ready(out_bf16)
    assert out_bf16.dtype == jnp.bfloat16
    assert jnp.allclose(out_bf16.astype(jnp.float32), ref, atol=1e-2, rtol=1e-2)

    print("KERNEL_OK")
</pallas_src>

<mosaic_0001>
module attributes {stable_mosaic.version = 11 : i64} {
  func.func @_patch_embed_kernel(%arg0: i32, %arg1: memref<32x128xbf16, #tpu.memory_space<vmem>>, %arg2: memref<128x128xbf16, #tpu.memory_space<vmem>>, %arg3: memref<1x128xf32, #tpu.memory_space<vmem>>, %arg4: memref<32x128xf32, #tpu.memory_space<vmem>>) attributes {dimension_semantics = [#tpu.dimension_semantics<parallel>], iteration_bounds = array<i64: 1>, scalar_prefetch = 0 : i64, scratch_operands = 0 : i64, tpu.core_type = #tpu.core_type<tc>, window_params = [{transform_indices = @transform_0, window_bounds = array<i64: 32, 128>}, {pipeline_mode = #tpu.pipeline_mode<synchronous>, transform_indices = @transform_1, window_bounds = array<i64: 128, 128>}, {pipeline_mode = #tpu.pipeline_mode<synchronous>, transform_indices = @transform_2, window_bounds = array<i64: 1, 128>}, {transform_indices = @transform_3, window_bounds = array<i64: 32, 128>}]} {
    %c0 = arith.constant 0 : index
    %c0_0 = arith.constant 0 : index
    %0 = vector.load %arg1[%c0, %c0_0] : memref<32x128xbf16, #tpu.memory_space<vmem>>, vector<32x128xbf16>
    %c0_1 = arith.constant 0 : index
    %c0_2 = arith.constant 0 : index
    %1 = vector.load %arg2[%c0_1, %c0_2] : memref<128x128xbf16, #tpu.memory_space<vmem>>, vector<128x128xbf16>
    %cst = arith.constant dense<0.000000e+00> : vector<32x128xf32>
    %2 = tpu.matmul %0, %1, %cst {dimension_numbers = #tpu.dot_dimension_numbers<[1], [0], [0], [1], [0, 0, 1, 1], [], []>} : vector<32x128xbf16>, vector<128x128xbf16>, vector<32x128xf32> -> vector<32x128xf32>
    %c0_3 = arith.constant 0 : index
    %c0_4 = arith.constant 0 : index
    %3 = vector.load %arg3[%c0_3, %c0_4] : memref<1x128xf32, #tpu.memory_space<vmem>>, vector<1x128xf32>
    %4 = vector.broadcast %3 : vector<1x128xf32> to vector<32x128xf32>
    %5 = arith.addf %2, %4 : vector<32x128xf32>
    %c0_5 = arith.constant 0 : index
    %c0_6 = arith.constant 0 : index
    %6 = vector.load %arg4[%c0_5, %c0_6] : memref<32x128xf32, #tpu.memory_space<vmem>>, vector<32x128xf32>
    tpu.vector_store %arg4[%c0_5, %c0_6], %5 {strides = array<i32>} : memref<32x128xf32, #tpu.memory_space<vmem>>, vector<32x128xf32>,
    return
  }
  func.func @transform_0(%arg0: i32) -> (i32, i32) {
    %c0_i32 = arith.constant 0 : i32
    %c0_i32_0 = arith.constant 0 : i32
    return %arg0, %c0_i32 : i32, i32
  }
  func.func @transform_1(%arg0: i32) -> (i32, i32) {
    %c0_i32 = arith.constant 0 : i32
    %c0_i32_0 = arith.constant 0 : i32
    %c0_i32_1 = arith.constant 0 : i32
    return %c0_i32, %c0_i32_0 : i32, i32
  }
  func.func @transform_2(%arg0: i32) -> (i32, i32) {
    %c0_i32 = arith.constant 0 : i32
    %c0_i32_0 = arith.constant 0 : i32
    %c0_i32_1 = arith.constant 0 : i32
    return %c0_i32, %c0_i32_0 : i32, i32
  }
  func.func @transform_3(%arg0: i32) -> (i32, i32) {
    %c0_i32 = arith.constant 0 : i32
    %c0_i32_0 = arith.constant 0 : i32
    return %arg0, %c0_i32 : i32, i32
  }
}

</mosaic_0001>

<bundles_post_ra>
// kernel: patch_embed.2
= control target key start
LH: loop header
LB: loop body
LE: loop exit
PB: predicated region body
PF: predicated region fallthrough
CT: control target
= control target key end

     0   :  { %s693_s0 = inlined_call_operand.vmem [shape: bf16[64,32], index: 0, kind: input, shape index: {}]   ;;  %s694_s1 = inlined_call_operand.<no memory space> [shape: bf16[], index: 1, kind: input, shape index: {}]   ;;  %s695_s2 = inlined_call_operand.vmem [shape: bf16[32,64], index: 2, kind: input, shape index: {}]   ;;  %s696_s3 = inlined_call_operand.vmem [shape: f32[1,32], index: 3, kind: input, shape index: {}]   ;;  %s697_s4 = inlined_call_operand.<no memory space> [shape: f32[], index: 4, kind: input, shape index: {}]   ;;  %s698_s5 = inlined_call_operand.hbm [shape: f32[32,128], index: 5, kind: output, shape index: {}]  }
   0x1   :  { %v10_v0 = vstv %s694_s1  ;;  %v20_v1 = vstv %s697_s4 }
   0x2   :  { %v11_v2 = vunpack.i.l.bf16 %v10_v0 }
   0x3   :  { %v40_v3 = vlaneseq  ;;  %v123_v4 = vld [vmem:[%s693_s0] sm:$0xff]   ;;  %v494_v5 = vld [vmem:[%s693_s0 + $0x8] sm:$0xff]   ;;  %v496_v6 = vld [vmem:[%s693_s0 + $0x10] sm:$0xff]  }
   0x4   :  { %v514_v7 = vpack.c.bf16 %v11_v2, %v11_v2  ;;  %v124_v8 = vunpack.c.l.bf16 %v123_v4  ;;  %v145_v9 = vunpack.c.h.bf16 %v123_v4  ;;  %v167_v10 = vunpack.c.l.bf16 %v494_v5  ;;  %v498_v12 = vld [vmem:[%s693_s0 + $0x18] sm:$0xff]   ;;  %v37_v13 = vld [vmem:[%s695_s2] sm:$0xff]   ;;  %v491_v14 = vld [vmem:[%s695_s2 + $0x8] sm:$0xff]  }
   0x5   :  { %v189_v11 = vunpack.c.h.bf16 %v494_v5  ;;  %v41_v15 = vand.u32 127, %v40_v3  ;;  %v211_v16 = vunpack.c.l.bf16 %v496_v6  ;;  %v233_v17 = vunpack.c.h.bf16 %v496_v6 }
   0x6   :  { %v255_v18 = vunpack.c.l.bf16 %v498_v12  ;;  %515 = vst [vmem:[#allocation20 + $0x20] sm:$0xff] %v514_v7   ;;  %520 = vst [vmem:[#allocation20 + $0x28] sm:$0xff] %v514_v7  }
   0x7   :  { %525 = vst [vmem:[#allocation20 + $0x30] sm:$0xff] %v514_v7   ;;  %530 = vst [vmem:[#allocation20 + $0x38] sm:$0xff] %v514_v7  }
   0x8   :  { %21 = vsyncpa [#allocation18], 0  ;;  %v277_v19 = vunpack.c.h.bf16 %v498_v12  ;;  %v38_v20 = vunpack.c.l.bf16 %v37_v13  ;;  %v59_v21 = vunpack.c.h.bf16 %v37_v13  ;;  %v81_v22 = vunpack.c.l.bf16 %v491_v14  ;;  %v320_v46 = vld [vmem:[%s696_s3] sm:$0x1]  ;;  %s600_s4 = smov [#allocation17]  }
   0x9   :  { %vm129_vm0 = vcmp.lt.s32.totalorder %v41_v15, 32  ;;  %vm43_vm1 = vcmp.lt.s32.totalorder %v41_v15, 64  ;;  %v103_v23 = vunpack.c.h.bf16 %v491_v14  ;;  %v322_v24 = vshrl.u32 %v40_v3, 7  ;;  %s479_s11 = sshll.u32 %s600_s4, 4  ;;  %s480_s11 = int_to_ptr.vmem [resolvable:$true] %s479_s11 }
   0xa   :  { %v130_v25 = vsel %vm129_vm0, %v124_v8, %v11_v2  ;;  %v151_v26 = vsel %vm129_vm0, %v145_v9, %v11_v2  ;;  %v173_v27 = vsel %vm129_vm0, %v167_v10, %v11_v2  ;;  %v195_v28 = vsel %vm129_vm0, %v189_v11, %v11_v2  ;;  %s575_s12 = scalar_lea.vmem %s480_s11, 512  ;;  %p580_p1 = scmp.lt.s32.totalorder %s480_s11, %s480_s11 }
   0xb   :  { %v599_v29 = vmov 0.0   ;;  %v217_v34 = vsel %vm129_vm0, %v211_v16, %v11_v2  ;;  %v239_v35 = vsel %vm129_vm0, %v233_v17, %v11_v2  ;;  %v261_v36 = vsel %vm129_vm0, %v255_v18, %v11_v2  ;;  %p576_p0 = scmp.ne.s32.totalorder %s480_s11, %s575_s12  ;;  %p581_p2 = scmp.lt.s32.totalorder %s575_s12, %s575_s12 }
   0xc   :  { %v131_v30 = vpack.c.bf16 %v599_v29, %v130_v25  ;;  %v153_v31 = vpack.c.bf16 %v599_v29, %v151_v26  ;;  %v175_v32 = vpack.c.bf16 %v599_v29, %v173_v27  ;;  %v197_v33 = vpack.c.bf16 %v599_v29, %v195_v28 }
   0xd   :  { %v283_v37 = vsel %vm129_vm0, %v277_v19, %v11_v2  ;;  %v219_v38 = vpack.c.bf16 %v599_v29, %v217_v34  ;;  %v241_v39 = vpack.c.bf16 %v599_v29, %v239_v35  ;;  %v263_v40 = vpack.c.bf16 %v599_v29, %v261_v36  ;;  %v569_v58 = vld [vmem:[#allocation20 + $0x20] sm:$0xff]   ;;  %v570_v59 = vld [vmem:[#allocation20 + $0x28] sm:$0xff]   ;;  %p582_p3 = por %p581_p2, %p580_p1 }
   0xe   :  { %133 = vst [vmem:[#allocation20] sm:$0xf] %v131_v30  ;;  %155 = vst [vmem:[#allocation20 + $0x4] sm:$0xf] %v153_v31  ;;  %v285_v41 = vpack.c.bf16 %v599_v29, %v283_v37  ;;  %v44_v42 = vsel %vm43_vm1, %v38_v20, %v11_v2  ;;  %v65_v43 = vsel %vm43_vm1, %v59_v21, %v11_v2  ;;  %vm324_vm2 = vcmp.lt.s32.totalorder %v322_v24, 1  ;;  %v571_v60 = vld [vmem:[#allocation20 + $0x30] sm:$0xff]  }
   0xf   :  { %177 = vst [vmem:[#allocation20 + $0x8] sm:$0xf] %v175_v32  ;;  %199 = vst [vmem:[#allocation20 + $0xc] sm:$0xf] %v197_v33  ;;  %v87_v44 = vsel %vm43_vm1, %v81_v22, %v11_v2  ;;  %v109_v45 = vsel %vm43_vm1, %v103_v23, %v11_v2  ;;  %v45_v47 = vpack.c.bf16 %v599_v29, %v44_v42  ;;  %v572_v61 = vld [vmem:[#allocation20 + $0x38] sm:$0xff]   ;;  %p583_p4 = pnand %p582_p3, %p576_p0 }
  0x10   :  { %221 = vst [vmem:[#allocation20 + $0x10] sm:$0xf] %v219_v38  ;;  %243 = vst [vmem:[#allocation20 + $0x14] sm:$0xf] %v241_v39  ;;  %v67_v48 = vpack.c.bf16 %v599_v29, %v65_v43  ;;  %v89_v49 = vpack.c.bf16 %v599_v29, %v87_v44  ;;  %v111_v50 = vpack.c.bf16 %v599_v29, %v109_v45 }
  0x11   :  { %265 = vst [vmem:[#allocation20 + $0x18] sm:$0xf] %v263_v40  ;;  %287 = vst [vmem:[#allocation20 + $0x1c] sm:$0xf] %v285_v41  ;;  %v325_v51 = vsel %vm324_vm2, %v320_v46, %v20_v1 }
  0x12   :  { %47 = vst [vmem:[#allocation19] sm:$0xf] %v45_v47  ;;  %69 = vst [vmem:[#allocation19 + $0x4] sm:$0xf] %v67_v48  ;;  %v330_v52 = vsel %vm129_vm0, %v325_v51, %v20_v1 }
  0x13   :  { %91 = vst [vmem:[#allocation19 + $0x8] sm:$0xf] %v89_v49  ;;  %113 = vst [vmem:[#allocation19 + $0xc] sm:$0xf] %v111_v50 }
  0x14   :  { %332 = vst [vmem:[#allocation21] sm:$0x1] %v330_v52 }
  0x15   :  { %v565_v53 = vld [vmem:[#allocation20] sm:$0xff]  }
  0x16   :  { %v566_v54 = vld [vmem:[#allocation20 + $0x8] sm:$0xff]   ;;  %541 = vmatprep.subr.bf16.mxu0 %v565_v53 }
  0x17   :  { %542 = vmatpush3.bf16.msra.mxu0 %v565_v53  ;;  %v567_v55 = vld [vmem:[#allocation20 + $0x10] sm:$0xff]  }
  0x18   :  { %543 = vmatprep.subr.bf16.mxu0 %v566_v54  ;;  %v568_v57 = vld [vmem:[#allocation20 + $0x18] sm:$0xff]  }
  0x19   :  { %v573_v56 = vld [vmem:[#allocation19] sm:$0xff]  }
  0x1a   :  { %557 = vmatprep.mubr.bf16.mxu0 %v573_v56  ;;  %v574_v62 = vld [vmem:[#allocation19 + $0x8] sm:$0xff]  }
  0x1b   :  { %544 = vmatpush3.bf16.msra.mxu0 %v566_v54  ;;  %v500_v63 = vld [vmem:[#allocation21] ss:$0 sm:$0xff] }
  0x1c   :  { %545 = vmatprep.subr.bf16.mxu0 %v567_v55 }
  0x1f   :  { %546 = vmatpush3.bf16.msra.mxu0 %v567_v55 }
  0x20   :  { %547 = vmatprep.subr.bf16.mxu0 %v568_v57 }
  0x23   :  { %548 = vmatpush3.bf16.msra.mxu0 %v568_v57 }
  0x24   :  { %549 = vmatprep.subr.bf16.mxu0 %v569_v58 }
  0x27   :  { %550 = vmatpush3.bf16.msra.mxu0 %v569_v58 }
  0x28   :  { %551 = vmatprep.subr.bf16.mxu0 %v570_v59 }
  0x2b   :  { %552 = vmatpush3.bf16.msra.mxu0 %v570_v59 }
  0x2c   :  { %553 = vmatprep.subr.bf16.mxu0 %v571_v60 }
  0x2f   :  { %554 = vmatpush3.bf16.msra.mxu0 %v571_v60 }
  0x30   :  { %555 = vmatprep.subr.bf16.mxu0 %v572_v61 }
  0x33   :  { %556 = vmatpush3.bf16.msra.mxu0 %v572_v61 }
  0x36   :  { %558 = vmatmul.mubr.bf16.vlgmr.msra.gmra.mrb[0].mxu0 %v574_v62 }
 0x109   :  { %v559_v0 = vpop.f32.mrb[0].mxu0 }
 0x10a   :  { %v464_v1 = vadd.f32 %v559_v0, %v500_v63  ;;  %v455_v2 = vpop.f32.mrb[1].mxu0 }
 0x10b   :  { %v456_v3 = vadd.f32 %v500_v63, %v455_v2  ;;  %v560_v4 = vpop.f32.mrb[2].mxu0 }
 0x10c   :  { %472 = vst [vmem:[#allocation17 + $0x10] sm:$0xff] %v464_v1  ;;  %v467_v5 = vadd.f32 %v560_v4, %v500_v63  ;;  %v458_v6 = vpop.f32.mrb[3].mxu0 }
 0x10d   :  { %470 = vst [vmem:[#allocation17] sm:$0xff] %v456_v3  ;;  %v459_v7 = vadd.f32 %v500_v63, %v458_v6 }
 0x10e   :  { %473 = vst [vmem:[#allocation17 + $0x18] sm:$0xff] %v467_v5 }
 0x10f   :  { %471 = vst [vmem:[#allocation17 + $0x8] sm:$0xff] %v459_v7 }
 0x110   :  { %586 = shalt.err (!%p583_p4)
}
 0x111   :  { %s587_s15 = scalar_lea.hbm %s698_s5, 512 }
 0x112   :  { %p588_p5 = scmp.ne.s32.totalorder %s698_s5, %s587_s15  ;;  %p591_p6 = scmp.lt.u32.totalorder %s587_s15, %s698_s5 }
 0x114   :  { %p593_p7 = pnand %p591_p6, %p588_p5 }
 0x116   :  { %596 = shalt.err (!%p593_p7)
}
 0x117   :  { %s601_s20 = smov 128   ;;  %s602_s21 = smov 8  }
 0x118   :  { %485 = dma.vmem_to_hbm [thread:$0]  %s480_s11, 512, %s698_s5, [#allocation18], %s601_s20, %s601_s20, %s602_s21  }
 0x119   :  { %597 = dma.done.wait [#allocation18], 512  }
 0x11a   :  { %598 = vsyncadd [#allocation18], 4294966784 }
 0x11b   :  { %489 = vsyncpa [#allocation18], 1 }

</bundles_post_ra>
